<compile_context>
chip_gen: v6e
topology: v6e:2x2x1
jax: 0.10.0
libtpu: 0.0.40
codegen_flags: <defaults>
</compile_context>

<pallas_src>
import math
import jax
import jax.numpy as jnp
from jax.experimental import pallas as pl
from jax.experimental.pallas import tpu as pltpu


# ----------------------------------------------------------------------------
# Kernel factory: fused MLP with n encoder layers + sigmoid decoder.
# refs = (x, w1, b1, ..., wn, bn, w_dec8, b_dec, out)
# ----------------------------------------------------------------------------
def _make_mlp_kernel(n_encoder_layers, compute_dtype):
    def kernel(*refs):
        x_ref = refs[0]                                   # (tb, F) input tile
        o_ref = refs[-1]                                  # (1, tb) f32 output
        p = refs[1:-1]                                    # weights / biases

        # Cast per-tile inside the kernel (no wrapper-side astype pass over x).
        h = x_ref[...].astype(compute_dtype)
        for layer in range(n_encoder_layers):
            w = p[2 * layer][...]                         # (in_f, out_f) cd
            b = p[2 * layer + 1][...]                     # (1, out_f) f32
            a = jnp.dot(h, w, preferred_element_type=jnp.float32)
            h = jnp.maximum(a + b, 0.0).astype(compute_dtype)

        w_dec8 = p[-2][...]                               # (8, H_last) cd
        b_dec = p[-1][0]                                  # f32 scalar (SMEM)

        # Decoder as an "NT" matmul contracting the feature axis of both
        # operands: output (8, tb) with the batch on lanes; row 0 is the
        # answer.  This keeps the logits lane-dense and avoids both a
        # degenerate (tb, H) @ (H, 1) matmul and a (tb, 1) single-lane result.
        # TODO(synk): if a bundle dump shows Mosaic making h the stationary MXU
        # operand here, switch to (tb,H)@(H,8) with w_dec^T stationary plus an
        # XLU transpose of the (tb,8) result (cannot bundle-inspect here).
        z = jax.lax.dot_general(
            w_dec8, h,
            dimension_numbers=(((1,), (1,)), ((), ())),
            preferred_element_type=jnp.float32)           # (8, tb)
        z = z[0:1, :] + b_dec                             # (1, tb) f32 logits

        # Sign-stable sigmoid via a single EUP tanh (exact, divide-free).
        o_ref[...] = 0.5 * jnp.tanh(0.5 * z) + 0.5

    return kernel


# ----------------------------------------------------------------------------
# Batch-tile selection: multiple of 128, bounded padding, even >=2-step grid
# when the batch is large enough (so v7x's 2 TensorCores both get work).
# ----------------------------------------------------------------------------
def _choose_batch_tiling(batch, tb_max):
    assert tb_max % 128 == 0 and tb_max > 0, "tb_max must be a multiple of 128"
    b128 = max(128, pl.cdiv(batch, 128) * 128)
    n_steps = pl.cdiv(b128, tb_max)
    if b128 >= 256:
        n_steps = max(n_steps, 2)          # give both v7x TCs work
    if n_steps > 1 and n_steps % 2:
        n_steps += 1                       # balanced 2-TC sharding
    tb = pl.cdiv(b128 // 128, n_steps) * 128
    grid_b = pl.cdiv(batch, tb)
    return tb, grid_b


# ----------------------------------------------------------------------------
# Wrapper: tiles the batch; constant params are whole-array VMEM/SMEM residents.
# ----------------------------------------------------------------------------
def binary_claim_classifier_forward(x, params, *, tb_max=2048,
                                    compute_dtype=jnp.bfloat16):
    """params = [(W, b), ...] with W shaped (in_features, out_features); the
    last pair is the decoder Linear(last_hidden, 1).  Returns probabilities of
    shape (B, 1) in float32."""
    *enc_params, (w_dec, b_dec) = params
    n_enc = len(enc_params)
    B, F = x.shape
    cd = jnp.dtype(compute_dtype)

    tb, grid_b = _choose_batch_tiling(B, tb_max)

    # x: the only pipelined operand.  No wrapper-side pad / astype: ragged
    # batches use Pallas's masked edge block, the cast happens in-kernel.
    inputs = [x]
    in_specs = [pl.BlockSpec((tb, F), lambda i: (i, 0))]

    # Constant weights/biases: non-pipelined whole-array residents.
    const_vmem = pl.BlockSpec(memory_space=pltpu.MemorySpace.VMEM)
    param_bytes = 0
    max_width = F
    for (w, b) in enc_params:
        in_f, out_f = w.shape
        max_width = max(max_width, out_f)
        w_c = jnp.asarray(w, jnp.float32).astype(cd)       # (in_f, out_f)
        b_c = jnp.asarray(b, jnp.float32).reshape(1, out_f)
        inputs += [w_c, b_c]
        in_specs += [const_vmem, const_vmem]
        param_bytes += w_c.size * w_c.dtype.itemsize + b_c.size * 4

    h_last = int(w_dec.shape[0])
    # Decoder weight as an (8, H_last) row-replicated block (MXU-friendly lhs).
    w_dec8 = jnp.tile(jnp.asarray(w_dec, jnp.float32).reshape(1, h_last),
                      (8, 1)).astype(cd)
    b_dec1 = jnp.asarray(b_dec, jnp.float32).reshape(1)     # scalar in SMEM
    inputs += [w_dec8, b_dec1]
    in_specs += [const_vmem, pl.BlockSpec(memory_space=pltpu.MemorySpace.SMEM)]
    param_bytes += w_dec8.size * w_dec8.dtype.itemsize + 4

    # VMEM budget: only raise the scoped limit when a large f32 sweep needs it
    # (v5e defaults to 16 MiB scoped VMEM).
    est_vmem = (2 * tb * F * x.dtype.itemsize        # double-buffered x tile
                + 2 * tb * 4                         # double-buffered out tile
                + param_bytes
                + 4 * tb * max_width * 4)            # live f32 intermediates
    vmem_limit = None if est_vmem <= 12 * 2**20 else min(2 * est_vmem, 60 * 2**20)

    # NOTE (further work, v6e/v7x): packing 4 batch rows per lane-row with
    # block-diagonal weights ((B,32)->(B/4,128), blockdiag(W) = (128,256)/... )
    # would fill the 256-wide MXU and cut vmatmul pushes ~4x per encoder layer.
    out = pl.pallas_call(
        _make_mlp_kernel(n_enc, cd),
        out_shape=jax.ShapeDtypeStruct((1, B), jnp.float32),
        grid_spec=pltpu.PrefetchScalarGridSpec(
            num_scalar_prefetch=0,
            grid=(grid_b,),
            in_specs=in_specs,
            # lane-dense output: batch mapped to lanes, block (1, tb)
            out_specs=pl.BlockSpec((1, tb), lambda i: (0, i)),
        ),
        compiler_params=pltpu.CompilerParams(
            dimension_semantics=("parallel",),
            vmem_limit_bytes=vmem_limit,
        ),
    )(*inputs)

    return out.reshape(B, 1)


# ----------------------------------------------------------------------------
# Deterministic parameter init (mimics PyTorch nn.Linear: U(+-1/sqrt(fan_in)))
# ----------------------------------------------------------------------------
def init_params(key, layer_neurons):
    params = []
    dims = layer_neurons + [1]  # encoder layers + decoder layer
    for in_f, out_f in zip(dims, dims[1:]):
        key, kw, kb = jax.random.split(key, 3)
        bound = 1.0 / math.sqrt(in_f)
        w = jax.random.uniform(kw, (in_f, out_f), jnp.float32, -bound, bound)
        b = jax.random.uniform(kb, (1, out_f), jnp.float32, -bound, bound)
        params.append((w, b))
    return params


# ----------------------------------------------------------------------------
# Plain-JAX reference of the PyTorch forward.  compute_dtype lets us build a
# matched bf16-matmul reference for a tight comparison (f32 accumulation,
# exactly mirroring the kernel's casts).
# ----------------------------------------------------------------------------
def reference_forward(x, params, compute_dtype):
    cd = jnp.dtype(compute_dtype)
    h = x.astype(cd)
    for w, b in params[:-1]:
        a = jnp.dot(h, jnp.asarray(w, jnp.float32).astype(cd),
                    preferred_element_type=jnp.float32)
        h = jnp.maximum(a + jnp.asarray(b, jnp.float32), 0.0).astype(cd)
    w_dec, b_dec = params[-1]
    z = jnp.dot(h, jnp.asarray(w_dec, jnp.float32).astype(cd),
                preferred_element_type=jnp.float32) + jnp.asarray(b_dec, jnp.float32)
    return 0.5 * jnp.tanh(0.5 * z) + 0.5   # == sigmoid(z), sign-stable


if __name__ == "__main__":
    key = jax.random.PRNGKey(0)

    # --- Test 1: DEFAULT bf16 compute, module-implied config
    #     (initial=32, hidden=[64, 32]); batch NOT a multiple of 128 so the
    #     masked edge-tile path is exercised; >=2 parallel grid steps.
    initial_layer, hidden_layers = 32, [64, 32]
    batch = 200
    key, kx, kp = jax.random.split(key, 3)
    x = jax.random.normal(kx, (batch, initial_layer), dtype=jnp.float32)
    params = init_params(kp, [initial_layer] + hidden_layers)

    out = jax.block_until_ready(binary_claim_classifier_forward(x, params))
    ref_bf16 = reference_forward(x, params, jnp.bfloat16)
    ref_f32 = reference_forward(x, params, jnp.float32)
    assert out.shape == (batch, 1)
    assert bool(jnp.all(jnp.isfinite(out)))
    assert jnp.allclose(out, ref_bf16, atol=5e-3), "bf16 kernel vs bf16 reference"
    assert jnp.allclose(out, ref_f32, atol=3e-2), "bf16 kernel vs f32 reference"

    # --- Test 2: f32 compute path, different encoder depth (generic kernel),
    #     batch divisible by the tile, 2-step grid.
    initial_layer2, hidden_layers2 = 32, [64, 48, 32]
    batch2 = 256
    key, kx2, kp2 = jax.random.split(key, 3)
    x2 = jax.random.normal(kx2, (batch2, initial_layer2), dtype=jnp.float32)
    params2 = init_params(kp2, [initial_layer2] + hidden_layers2)

    out2 = jax.block_until_ready(
        binary_claim_classifier_forward(x2, params2, tb_max=128,
                                        compute_dtype=jnp.float32))
    ref2 = reference_forward(x2, params2, jnp.float32)
    assert out2.shape == (batch2, 1)
    assert jnp.allclose(out2, ref2, atol=1e-4), "f32 kernel vs f32 reference"

    # TODO(synk): fit()/predict()/evaluate_architecture()/plot_* are host-side
    # training & evaluation utilities (Adam/BCELoss loop, sklearn metrics,
    # matplotlib) and are not kernel work; only forward() is in Pallas.
    print("KERNEL_OK")
</pallas_src>

<mosaic_0001>
module attributes {stable_mosaic.version = 11 : i64} {
  func.func @kernel(%arg0: i32, %arg1: memref<128x32xf32, #tpu.memory_space<vmem>>, %arg2: memref<32x64xbf16, #tpu.memory_space<vmem>>, %arg3: memref<1x64xf32, #tpu.memory_space<vmem>>, %arg4: memref<64x32xbf16, #tpu.memory_space<vmem>>, %arg5: memref<1x32xf32, #tpu.memory_space<vmem>>, %arg6: memref<8x32xbf16, #tpu.memory_space<vmem>>, %arg7: memref<1xf32, #tpu.memory_space<smem>>, %arg8: memref<1x128xf32, #tpu.memory_space<vmem>>) attributes {dimension_semantics = [#tpu.dimension_semantics<parallel>], iteration_bounds = array<i64: 2>, scalar_prefetch = 0 : i64, scratch_operands = 0 : i64, tpu.core_type = #tpu.core_type<tc>, window_params = [{transform_indices = @transform_0, window_bounds = array<i64: 128, 32>}, {pipeline_mode = #tpu.pipeline_mode<synchronous>, transform_indices = @transform_1, window_bounds = array<i64: 32, 64>}, {pipeline_mode = #tpu.pipeline_mode<synchronous>, transform_indices = @transform_2, window_bounds = array<i64: 1, 64>}, {pipeline_mode = #tpu.pipeline_mode<synchronous>, transform_indices = @transform_3, window_bounds = array<i64: 64, 32>}, {pipeline_mode = #tpu.pipeline_mode<synchronous>, transform_indices = @transform_4, window_bounds = array<i64: 1, 32>}, {pipeline_mode = #tpu.pipeline_mode<synchronous>, transform_indices = @transform_5, window_bounds = array<i64: 8, 32>}, {transform_indices = @transform_6, window_bounds = array<i64: 1>}, {transform_indices = @transform_7, window_bounds = array<i64: 1, 128>}]} {
    %c0 = arith.constant 0 : index
    %c0_0 = arith.constant 0 : index
    %0 = vector.load %arg1[%c0, %c0_0] : memref<128x32xf32, #tpu.memory_space<vmem>>, vector<128x32xf32>
    %1 = arith.truncf %0 : vector<128x32xf32> to vector<128x32xbf16>
    %c0_1 = arith.constant 0 : index
    %c0_2 = arith.constant 0 : index
    %2 = vector.load %arg2[%c0_1, %c0_2] : memref<32x64xbf16, #tpu.memory_space<vmem>>, vector<32x64xbf16>
    %c0_3 = arith.constant 0 : index
    %c0_4 = arith.constant 0 : index
    %3 = vector.load %arg3[%c0_3, %c0_4] : memref<1x64xf32, #tpu.memory_space<vmem>>, vector<1x64xf32>
    %cst = arith.constant dense<0.000000e+00> : vector<128x64xf32>
    %4 = tpu.matmul %1, %2, %cst {dimension_numbers = #tpu.dot_dimension_numbers<[1], [0], [0], [1], [0, 0, 1, 1], [], []>} : vector<128x32xbf16>, vector<32x64xbf16>, vector<128x64xf32> -> vector<128x64xf32>
    %5 = vector.broadcast %3 : vector<1x64xf32> to vector<128x64xf32>
    %6 = arith.addf %4, %5 : vector<128x64xf32>
    %cst_5 = arith.constant 0.000000e+00 : f32
    %7 = vector.broadcast %cst_5 : f32 to vector<128x64xf32>
    %8 = arith.maximumf %6, %7 : vector<128x64xf32>
    %9 = arith.truncf %8 : vector<128x64xf32> to vector<128x64xbf16>
    %c0_6 = arith.constant 0 : index
    %c0_7 = arith.constant 0 : index
    %10 = vector.load %arg4[%c0_6, %c0_7] : memref<64x32xbf16, #tpu.memory_space<vmem>>, vector<64x32xbf16>
    %c0_8 = arith.constant 0 : index
    %c0_9 = arith.constant 0 : index
    %11 = vector.load %arg5[%c0_8, %c0_9] : memref<1x32xf32, #tpu.memory_space<vmem>>, vector<1x32xf32>
    %cst_10 = arith.constant dense<0.000000e+00> : vector<128x32xf32>
    %12 = tpu.matmul %9, %10, %cst_10 {dimension_numbers = #tpu.dot_dimension_numbers<[1], [0], [0], [1], [0, 0, 1, 1], [], []>} : vector<128x64xbf16>, vector<64x32xbf16>, vector<128x32xf32> -> vector<128x32xf32>
    %13 = vector.broadcast %11 : vector<1x32xf32> to vector<128x32xf32>
    %14 = arith.addf %12, %13 : vector<128x32xf32>
    %cst_11 = arith.constant 0.000000e+00 : f32
    %15 = vector.broadcast %cst_11 : f32 to vector<128x32xf32>
    %16 = arith.maximumf %14, %15 : vector<128x32xf32>
    %17 = arith.truncf %16 : vector<128x32xf32> to vector<128x32xbf16>
    %c0_12 = arith.constant 0 : index
    %c0_13 = arith.constant 0 : index
    %18 = vector.load %arg6[%c0_12, %c0_13] : memref<8x32xbf16, #tpu.memory_space<vmem>>, vector<8x32xbf16>
    %c0_14 = arith.constant 0 : index
    %19 = memref.load %arg7[%c0_14] : memref<1xf32, #tpu.memory_space<smem>>
    %cst_15 = arith.constant dense<0.000000e+00> : vector<8x128xf32>
    %20 = tpu.matmul %18, %17, %cst_15 {dimension_numbers = #tpu.dot_dimension_numbers<[1], [1], [0], [0], [0, 0, 1, 0], [], []>} : vector<8x32xbf16>, vector<128x32xbf16>, vector<8x128xf32> -> vector<8x128xf32>
    %21 = vector.extract_strided_slice %20 {offsets = [0, 0], sizes = [1, 128], strides = [1, 1]} : vector<8x128xf32> to vector<1x128xf32>
    %22 = vector.broadcast %19 : f32 to vector<1x128xf32>
    %23 = arith.addf %21, %22 : vector<1x128xf32>
    %cst_16 = arith.constant 5.000000e-01 : f32
    %24 = vector.broadcast %cst_16 : f32 to vector<1x128xf32>
    %25 = arith.mulf %24, %23 : vector<1x128xf32>
    %26 = math.tanh %25 : vector<1x128xf32>
    %cst_17 = arith.constant 5.000000e-01 : f32
    %27 = vector.broadcast %cst_17 : f32 to vector<1x128xf32>
    %28 = arith.mulf %27, %26 : vector<1x128xf32>
    %cst_18 = arith.constant 5.000000e-01 : f32
    %29 = vector.broadcast %cst_18 : f32 to vector<1x128xf32>
    %30 = arith.addf %28, %29 : vector<1x128xf32>
    %c0_19 = arith.constant 0 : index
    %c0_20 = arith.constant 0 : index
    %31 = vector.load %arg8[%c0_19, %c0_20] : memref<1x128xf32, #tpu.memory_space<vmem>>, vector<1x128xf32>
    tpu.vector_store %arg8[%c0_19, %c0_20], %30 {strides = array<i32>} : memref<1x128xf32, #tpu.memory_space<vmem>>, vector<1x128xf32>,
    return
  }
  func.func @transform_0(%arg0: i32) -> (i32, i32) {
    %c0_i32 = arith.constant 0 : i32
    %c0_i32_0 = arith.constant 0 : i32
    return %arg0, %c0_i32 : i32, i32
  }
  func.func @transform_1(%arg0: i32) -> (i32, i32) {
    %c0_i32 = arith.constant 0 : i32
    %c0_i32_0 = arith.constant 0 : i32
    %c0_i32_1 = arith.constant 0 : i32
    return %c0_i32, %c0_i32_0 : i32, i32
  }
  func.func @transform_2(%arg0: i32) -> (i32, i32) {
    %c0_i32 = arith.constant 0 : i32
    %c0_i32_0 = arith.constant 0 : i32
    %c0_i32_1 = arith.constant 0 : i32
    return %c0_i32, %c0_i32_0 : i32, i32
  }
  func.func @transform_3(%arg0: i32) -> (i32, i32) {
    %c0_i32 = arith.constant 0 : i32
    %c0_i32_0 = arith.constant 0 : i32
    %c0_i32_1 = arith.constant 0 : i32
    return %c0_i32, %c0_i32_0 : i32, i32
  }
  func.func @transform_4(%arg0: i32) -> (i32, i32) {
    %c0_i32 = arith.constant 0 : i32
    %c0_i32_0 = arith.constant 0 : i32
    %c0_i32_1 = arith.constant 0 : i32
    return %c0_i32, %c0_i32_0 : i32, i32
  }
  func.func @transform_5(%arg0: i32) -> (i32, i32) {
    %c0_i32 = arith.constant 0 : i32
    %c0_i32_0 = arith.constant 0 : i32
    %c0_i32_1 = arith.constant 0 : i32
    return %c0_i32, %c0_i32_0 : i32, i32
  }
  func.func @transform_6(%arg0: i32) -> i32 {
    %c0_i32 = arith.constant 0 : i32
    %c0_i32_0 = arith.constant 0 : i32
    return %c0_i32 : i32
  }
  func.func @transform_7(%arg0: i32) -> (i32, i32) {
    %c0_i32 = arith.constant 0 : i32
    %c0_i32_0 = arith.constant 0 : i32
    return %c0_i32, %arg0 : i32, i32
  }
}

</mosaic_0001>

<bundles_post_ra>
// kernel: tpu_custom_call.1
= control target key start
LH: loop header
LB: loop body
LE: loop exit
PB: predicated region body
PF: predicated region fallthrough
CT: control target
= control target key end

     0   :  { %s1291_s0 = inlined_call_operand.vmem [shape: f32[200,32], index: 0, kind: input, shape index: {}]   ;;  %s1292_s1 = inlined_call_operand.vmem [shape: bf16[32,64], index: 1, kind: input, shape index: {}]   ;;  %s1293_s2 = inlined_call_operand.vmem [shape: f32[1,64], index: 2, kind: input, shape index: {}]   ;;  %s1294_s3 = inlined_call_operand.vmem [shape: bf16[64,32], index: 3, kind: input, shape index: {}]   ;;  %s1295_s4 = inlined_call_operand.vmem [shape: f32[1,32], index: 4, kind: input, shape index: {}]   ;;  %s1296_s5 = inlined_call_operand.vmem [shape: bf16[8,32], index: 5, kind: input, shape index: {}]   ;;  %s1297_s6 = inlined_call_operand.<no memory space> [shape: f32[1], index: 6, kind: input, shape index: {}]   ;;  %s1298_s7 = inlined_call_operand.hbm [shape: f32[1,200], index: 7, kind: output, shape index: {}]  }
   0x1   :  { %12 = sst [smem:[#allocation2]] %s1297_s6 }
   0x2   :  { %13 = vsyncpa [#allocation4], 0 }
   0x3   :  { %15 = vsyncpa [#allocation4 + $0x1], 0  ;;  %s1108_s26 = smov 0   ;;  %s1110_s27 = smov 0  }
   0x4   :  { %s1112_s28 = smov 0   ;;  %s1114_s29 = smov 0  }
   0x5 LB: > { %s821_s6 = sadd.s32 4294967295, %s1060_s29   ;;  %s822_s30 = sadd.s32 4294967294, %s1060_s29   ;;  %s1060_s29 = sphi %s1114_s29, %s1304_s29   ;;  %s1056_s28 = sphi %s1112_s28, %s1303_s28   ;;  %s1052_s27 = sphi %s1110_s27, %s1302_s27   ;;  %s1048_s26 = sphi %s1108_s26, %s1301_s26  }
   0x6   : > { %s1131_s8 = sadd.s32 1, %s1060_s29   ;;  %s180_s9 = sadd.s32 1, %s1056_s28 }
   0x7   : > { %s177_s10 = ssub.s32 %s1060_s29, %s1131_s8  ;;  %p190_p0 = scmp.ne.s32.totalorder %s1056_s28, %s1052_s27 }
   0x8   : > { %p178_p1 = scmp.eq.s32.totalorder %s177_s10, 0  ;;  %p191_p2 = scmp.eq.s32.totalorder %s821_s6, 1 }
   0x9   : > { %p196_p3 = scmp.ne.s32.totalorder %s1052_s27, %s1048_s26  ;;  %p197_p4 = scmp.eq.s32.totalorder %s822_s30, 1 }
   0xa   : > { %s1141_s11 = scalar_select %p178_p1, %s1056_s28, %s180_s9  }
   0xb   : > { %p1143_p5 = por %p191_p2, %p190_p0  ;;  %p1147_p6 = por %p197_p4, %p196_p3 }
   0xc   : > { %p825_p7 = scmp.ge.s32.totalorder %s1060_s29, 1  ;;  %p250_p8 = scmp.lt.s32.totalorder %s1060_s29, 3 }
   0xe   : > { %p251_p9 = pnand %p825_p7, %p250_p8 }
   0xf   : > { %s1156_s16 = sshll.u32 (!%p251_p9), %s821_s6, 4  ;;  %s679_s23 = sld [smem:[#allocation2]] (!%p251_p9) }
  0x10   : > { %254 = sbr.rel (%p251_p9) target bundleno = 755 (0x2f3), region = 48  ;;  %p290_p10 = scmp.lt.s32.totalorder (!%p251_p9), %s1156_s16, 24 }
  0x11   : > { %s283_s24 = sand.u32 (!%p251_p9), 1, %s1052_s27   ;;  %s765_s10 = scalar_lea.hbm (!%p251_p9), %s1298_s7, %s1156_s16 }
  0x12   : > { %s755_s14 = scalar_lea.sflag (!%p251_p9), [#allocation4], %s283_s24  ;;  %s1064_s17 = smov (!%p251_p9), [#allocation3]  }
  0x13   : > { %s1004_s18 = sshll.u32 (!%p251_p9), %s1064_s17, 4  ;;  %s1005_s18 = int_to_ptr.vmem [resolvable:$false] %s1004_s18 }
  0x15   : > { %v992_v0 = vld [vmem:[%s1292_s1 + $0x8] sm:$0xff]   ;;  %v993_v1 = vld [vmem:[%s1292_s1] sm:$0xff]   ;;  %s291_s19 = scalar_select %p290_p10, %s1156_s16, 24  ;;  %v994_v2 = vld [vmem:[%s1294_s3 + $0x18] sm:$0xff]   ;;  %vm347_vm0 = vcmask 261120   ;;  %vm532_vm1 = vcmask 523264  }
  0x16   : > { %887 = vmatprep.subr.bf16.mxu1 %v992_v0  ;;  %v995_v12 = vld [vmem:[%s1294_s3 + $0x10] sm:$0xff]   ;;  %v996_v17 = vld [vmem:[%s1294_s3 + $0x8] sm:$0xff]   ;;  %v997_v29 = vld [vmem:[%s1294_s3] sm:$0xff]   ;;  %vm1063_vm2 = vmmov 0  }
  0x17   : > { %888 = vmatpush3.bf16.msra.mxu1 %v992_v0  ;;  %s827_s22 = sshll.u32 %s291_s19, 3  ;;  %v828_v32 = vld [vmem:[%s1293_s2] ss:$0 sm:$0xff]  ;;  %s1006_s19 = scalar_lea.vmem %s1005_s18, 32 }
  0x18   : > { %889 = vmatprep.subr.bf16.mxu1 %v993_v1  ;;  %s1169_s25 = scalar_lea.vmem %s1291_s0, %s827_s22 }
  0x19   : > { %v300_v3 = vld [vmem:[%s1169_s25] sm:$0xff]  ;;  %v301_v4 = vld [vmem:[%s1169_s25 + $0x8] sm:$0xff]  ;;  %v302_v5 = vld [vmem:[%s1169_s25 + $0x10] sm:$0xff] }
  0x1a   : > { %v316_v6 = vpack.c.bf16 %v301_v4, %v300_v3  ;;  %v303_v7 = vld [vmem:[%s1169_s25 + $0x18] sm:$0xff]  ;;  %v304_v8 = vld [vmem:[%s1169_s25 + $0x20] sm:$0xff]  ;;  %v305_v9 = vld [vmem:[%s1169_s25 + $0x28] sm:$0xff] }
  0x1b   : > { %890 = vmatpush3.bf16.msra.mxu1 %v993_v1  ;;  %v317_v10 = vpack.c.bf16 %v303_v7, %v302_v5  ;;  %v318_v11 = vpack.c.bf16 %v305_v9, %v304_v8  ;;  %v306_v13 = vld [vmem:[%s1169_s25 + $0x30] sm:$0xff]  ;;  %v307_v14 = vld [vmem:[%s1169_s25 + $0x38] sm:$0xff]  ;;  %v308_v15 = vld [vmem:[%s1169_s25 + $0x40] sm:$0xff] }
  0x1c   : > { %907 = vmatprep.subr.bf16.mxu1 %v994_v2  ;;  %891 = vmatprep.mubr.msk.bf16.mxu1 %vm347_vm0, %v316_v6  ;;  %v309_v16 = vld [vmem:[%s1169_s25 + $0x48] sm:$0xff]  ;;  %v319_v18 = vpack.c.bf16 %v307_v14, %v306_v13  ;;  %v310_v20 = vld [vmem:[%s1169_s25 + $0x50] sm:$0xff]  ;;  %v311_v21 = vld [vmem:[%s1169_s25 + $0x58] sm:$0xff] }
  0x1d   : > { %v320_v19 = vpack.c.bf16 %v309_v16, %v308_v15  ;;  %v312_v22 = vld [vmem:[%s1169_s25 + $0x60] sm:$0xff]  ;;  %v313_v23 = vld [vmem:[%s1169_s25 + $0x68] sm:$0xff]  ;;  %v321_v24 = vpack.c.bf16 %v311_v21, %v310_v20  ;;  %v314_v26 = vld [vmem:[%s1169_s25 + $0x70] sm:$0xff] }
  0x1e   : > { %892 = vmatmul.mubr.msk.bf16.vlgmr.msra.gmra.mxu1 %vm347_vm0, %v317_v10  ;;  %v322_v25 = vpack.c.bf16 %v313_v23, %v312_v22  ;;  %v315_v27 = vld [vmem:[%s1169_s25 + $0x78] sm:$0xff]  ;;  %v1062_v23 = vmov 0.0   ;;  %s284_s25 = scalar_lea.vmem [#allocation3], %s283_s24 }
  0x1f   : > { %895 = vmatprep.mubr.msk.bf16.mxu1 %vm347_vm0, %v318_v11  ;;  %908 = vmatpush3.bf16.msra.mxu1 %v994_v2  ;;  %v323_v28 = vpack.c.bf16 %v315_v27, %v314_v26  ;;  %s767_s6 = sshll.u32 %s284_s25, 4  ;;  %s768_s6 = int_to_ptr.vmem [resolvable:$true] %s767_s6 }
  0x20   : > { %909 = vmatprep.subr.bf16.mxu1 %v995_v12  ;;  %931 = vmatprep.subr.bf16.mxu0 %v1062_v23  ;;  %s1000_s15 = scalar_lea.vmem %s768_s6, 16  ;;  %p1007_p0 = scmp.lt.s32.totalorder %s768_s6, %s1005_s18 }
  0x21   : > { %947 = vmatprep.mubr.msk.bf16.mxu0 %vm1063_vm2, %v1062_v23  ;;  %p1001_p11 = scmp.ne.s32.totalorder %s768_s6, %s1000_s15  ;;  %p1008_p1 = scmp.lt.s32.totalorder %s1006_s19, %s1000_s15 }
  0x23   : > { %910 = vmatpush3.bf16.msra.mxu1 %v995_v12  ;;  %p1002_p12 = pnand %p1001_p11, %p1143_p5  ;;  %p1009_p2 = por %p1008_p1, %p1007_p0 }
  0x24   : > { %911 = vmatprep.subr.bf16.mxu1 %v996_v17 }
  0x25   : > { %p1003_p13 = pneg %p1002_p12 }
  0x26   : > { %896 = vmatmul.mubr.msk.bf16.gmra.mxu1 %vm347_vm0, %v319_v18 }
  0x27   : > { %899 = vmatprep.mubr.msk.bf16.mxu1 %vm347_vm0, %v320_v19  ;;  %912 = vmatpush3.bf16.msra.mxu1 %v996_v17  ;;  %p1010_p3 = pnand %p1009_p2, %p1003_p13 }
  0x28   : > { %913 = vmatprep.subr.bf16.mxu1 %v997_v29 }
  0x2b   : > { %914 = vmatpush3.bf16.msra.mxu1 %v997_v29 }
  0x2e   : > { %900 = vmatmul.mubr.msk.bf16.gmra.mxu1 %vm347_vm0, %v321_v24 }
  0x2f   : > { %903 = vmatprep.mubr.msk.bf16.mxu1 %vm347_vm0, %v322_v25  ;;  %v1220_v25 = vld [vmem:[%s1295_s4] ss:$0 sm:$0xff] }
  0x36   : > { %904 = vmatmul.mubr.msk.bf16.gmra.mxu1 %vm347_vm0, %v323_v28 }
  0xde   : > { %v893_v30 = vpop.f32.mrf.mxu1 }
  0xdf   : > { %v415_v36 = vadd.f32 %v893_v30, %v828_v32 }
  0xe0   : > { %v406_v31 = vpop.f32.mrf.mxu1 }
  0xe1   : > { %v407_v34 = vadd.f32 %v828_v32, %v406_v31  ;;  %v471_v43 = vmax.f32 %v415_v36, 0.0 }
  0xe2   : > { %v894_v33 = vpop.f32.mrf.mxu1 }
  0xe3   : > { %v418_v35 = vadd.f32 %v894_v33, %v828_v32  ;;  %v469_v41 = vmax.f32 %v407_v34, 0.0 }
  0xe4   : > { %v409_v37 = vpop.f32.mrf.mxu1 }
  0xe5   : > { %v410_v38 = vadd.f32 %v828_v32, %v409_v37  ;;  %v472_v39 = vmax.f32 %v418_v35, 0.0 }
  0xe6   : > { %v897_v40 = vpop.f32.mrf.mxu1 }
  0xe7   : > { %v470_v42 = vmax.f32 %v410_v38, 0.0  ;;  %v486_v46 = vpack.c.bf16 %v472_v39, %v471_v43  ;;  %v431_v50 = vadd.f32 %v897_v40, %v828_v32 }
  0xe8   : > { %v422_v44 = vpop.f32.mrf.mxu1 }
  0xe9   : > { %v485_v45 = vpack.c.bf16 %v470_v42, %v469_v41  ;;  %v423_v48 = vadd.f32 %v828_v32, %v422_v44  ;;  %v475_v57 = vmax.f32 %v431_v50, 0.0 }
  0xea   : > { %v898_v47 = vpop.f32.mrf.mxu1 }
  0xeb   : > { %v434_v49 = vadd.f32 %v898_v47, %v828_v32  ;;  %915 = vmatprep.mubr.msk.bf16.mxu1 %vm532_vm1, %v485_v45  ;;  %v473_v55 = vmax.f32 %v423_v48, 0.0 }
  0xec   : > { %v425_v51 = vpop.f32.mrf.mxu1  ;;  %916 = vmatmul.mubr.msk.bf16.vlgmr.msra.gmra.mxu1 %vm532_vm1, %v486_v46 }
  0xed   : > { %v426_v52 = vadd.f32 %v828_v32, %v425_v51  ;;  %v476_v53 = vmax.f32 %v434_v49, 0.0 }
  0xee   : > { %v901_v54 = vpop.f32.mrf.mxu1 }
  0xef   : > { %v474_v56 = vmax.f32 %v426_v52, 0.0  ;;  %v488_v60 = vpack.c.bf16 %v476_v53, %v475_v57  ;;  %v447_v0 = vadd.f32 %v901_v54, %v828_v32 }
  0xf0   : > { %v438_v58 = vpop.f32.mrf.mxu1 }
  0xf1   : > { %v487_v59 = vpack.c.bf16 %v474_v56, %v473_v55  ;;  %v439_v62 = vadd.f32 %v828_v32, %v438_v58  ;;  %v479_v7 = vmax.f32 %v447_v0, 0.0 }
  0xf2   : > { %v902_v61 = vpop.f32.mrf.mxu1 }
  0xf3   : > { %v450_v63 = vadd.f32 %v902_v61, %v828_v32  ;;  %919 = vmatprep.mubr.msk.bf16.mxu1 %vm532_vm1, %v487_v59  ;;  %v477_v5 = vmax.f32 %v439_v62, 0.0 }
  0xf4   : > { %v441_v1 = vpop.f32.mrf.mxu1  ;;  %920 = vmatmul.mubr.msk.bf16.gmra.mxu1 %vm532_vm1, %v488_v60 }
  0xf5   : > { %v442_v2 = vadd.f32 %v828_v32, %v441_v1  ;;  %v480_v3 = vmax.f32 %v450_v63, 0.0 }
  0xf6   : > { %v905_v4 = vpop.f32.mrf.mxu1 }
  0xf7   : > { %v478_v6 = vmax.f32 %v442_v2, 0.0  ;;  %v490_v10 = vpack.c.bf16 %v480_v3, %v479_v7  ;;  %v463_v14 = vadd.f32 %v905_v4, %v828_v32 }
  0xf8   : > { %v454_v8 = vpop.f32.mrf.mxu1 }
  0xf9   : > { %v489_v9 = vpack.c.bf16 %v478_v6, %v477_v5  ;;  %v455_v12 = vadd.f32 %v828_v32, %v454_v8  ;;  %v483_v20 = vmax.f32 %v463_v14, 0.0 }
  0xfa   : > { %v906_v11 = vpop.f32.mrf.mxu1 }
  0xfb   : > { %v466_v13 = vadd.f32 %v906_v11, %v828_v32  ;;  %923 = vmatprep.mubr.msk.bf16.mxu1 %vm532_vm1, %v489_v9  ;;  %v481_v18 = vmax.f32 %v455_v12, 0.0 }
  0xfc   : > { %v457_v15 = vpop.f32.mrf.mxu1  ;;  %924 = vmatmul.mubr.msk.bf16.gmra.mxu1 %vm532_vm1, %v490_v10 }
  0xfd   : > { %v458_v16 = vadd.f32 %v828_v32, %v457_v15  ;;  %v484_v17 = vmax.f32 %v466_v13, 0.0 }
  0xff   : > { %v482_v19 = vmax.f32 %v458_v16, 0.0  ;;  %v492_v22 = vpack.c.bf16 %v484_v17, %v483_v20 }
 0x101   : > { %v491_v21 = vpack.c.bf16 %v482_v19, %v481_v18 }
 0x103   : > { %927 = vmatprep.mubr.msk.bf16.mxu1 %vm532_vm1, %v491_v21 }
 0x104   : > { %928 = vmatmul.mubr.msk.bf16.gmra.mxu1 %vm532_vm1, %v492_v22 }
 0x1ac   : > { %v917_v24 = vpop.f32.mrf.mxu1 }
 0x1ad   : > { %v600_v27 = vadd.f32 %v917_v24, %v1220_v25 }
 0x1ae   : > { %v591_v26 = vpop.f32.mrf.mxu1 }
 0x1af   : > { %v592_v29 = vadd.f32 %v1220_v25, %v591_v26  ;;  %v656_v32 = vmax.f32 %v600_v27, 0.0  ;;  %v678_v26 = vld [vmem:[%s1296_s5] sm:$0xf]  ;;  %v747_v27 = vstv %s679_s23 }
 0x1b0   : > { %v918_v28 = vpop.f32.mrf.mxu1 }
 0x1b1   : > { %v603_v30 = vadd.f32 %v918_v28, %v1220_v25  ;;  %v654_v36 = vmax.f32 %v592_v29, 0.0 }
 0x1b2   : > { %v594_v31 = vpop.f32.mrf.mxu1 }
 0x1b3   : > { %v657_v33 = vmax.f32 %v603_v30, 0.0  ;;  %v595_v34 = vadd.f32 %v1220_v25, %v594_v31 }
 0x1b4   : > { %v921_v35 = vpop.f32.mrf.mxu1 }
 0x1b5   : > { %v671_v37 = vpack.c.bf16 %v657_v33, %v656_v32  ;;  %v655_v38 = vmax.f32 %v595_v34, 0.0  ;;  %v616_v11 = vadd.f32 %v921_v35, %v1220_v25 }
 0x1b6   : > { %v607_v39 = vpop.f32.mrf.mxu1 }
 0x1b7   : > { %v670_v40 = vpack.c.bf16 %v655_v38, %v654_v36  ;;  %v660_v14 = vmax.f32 %v616_v11, 0.0  ;;  %v608_v17 = vadd.f32 %v1220_v25, %v607_v39  ;;  %v687_v24 = vsel %vm347_vm0, %v671_v37, 0 }
 0x1b8   : > { %v922_v41 = vpop.f32.mrf.mxu1 }
 0x1b9   : > { %v619_v9 = vadd.f32 %v922_v41, %v1220_v25  ;;  %v658_v20 = vmax.f32 %v608_v17, 0.0 }
 0x1ba   : > { %v610_v42 = vpop.f32.mrf.mxu1 }
 0x1bb   : > { %v661_v12 = vmax.f32 %v619_v9, 0.0  ;;  %v611_v16 = vadd.f32 %v1220_v25, %v610_v42 }
 0x1bc   : > { %v925_v43 = vpop.f32.mrf.mxu1 }
 0x1bd   : > { %v632_v63 = vadd.f32 %v925_v43, %v1220_v25  ;;  %v673_v15 = vpack.c.bf16 %v661_v12, %v660_v14  ;;  %v659_v18 = vmax.f32 %v611_v16, 0.0 }
 0x1be   : > { %v623_v44 = vpop.f32.mrf.mxu1 }
 0x1bf   : > { %v664_v2 = vmax.f32 %v632_v63, 0.0  ;;  %v624_v5 = vadd.f32 %v1220_v25, %v623_v44  ;;  %v693_v19 = vsel %vm347_vm0, %v673_v15, 0  ;;  %v672_v21 = vpack.c.bf16 %v659_v18, %v658_v20 }
 0x1c0   : > { %v926_v45 = vpop.f32.mrf.mxu1 }
 0x1c1   : > { %v635_v61 = vadd.f32 %v926_v45, %v1220_v25  ;;  %v662_v8 = vmax.f32 %v624_v5, 0.0  ;;  %v690_v22 = vsel %vm347_vm0, %v672_v21, 0 }
 0x1c2   : > { %v626_v46 = vpop.f32.mrf.mxu1 }
 0x1c3   : > { %v665_v0 = vmax.f32 %v635_v61, 0.0  ;;  %v627_v4 = vadd.f32 %v1220_v25, %v626_v46 }
 0x1c4   : > { %v929_v47 = vpop.f32.mrf.mxu1 }
 0x1c5   : > { %v648_v49 = vadd.f32 %v929_v47, %v1220_v25  ;;  %v675_v3 = vpack.c.bf16 %v665_v0, %v664_v2  ;;  %v663_v6 = vmax.f32 %v627_v4, 0.0 }
 0x1c6   : > { %v639_v48 = vpop.f32.mrf.mxu1 }
 0x1c7   : > { %v668_v53 = vmax.f32 %v648_v49, 0.0  ;;  %v640_v56 = vadd.f32 %v1220_v25, %v639_v48  ;;  %v699_v7 = vsel %vm347_vm0, %v675_v3, 0  ;;  %v674_v10 = vpack.c.bf16 %v663_v6, %v662_v8 }
 0x1c8   : > { %v930_v50 = vpop.f32.mrf.mxu1 }
 0x1c9   : > { %v651_v51 = vadd.f32 %v930_v50, %v1220_v25  ;;  %v666_v60 = vmax.f32 %v640_v56, 0.0  ;;  %v696_v13 = vsel %vm347_vm0, %v674_v10, 0 }
 0x1ca   : > { %v642_v52 = vpop.f32.mrf.mxu1 }
 0x1cb   : > { %v669_v54 = vmax.f32 %v651_v51, 0.0  ;;  %v643_v55 = vadd.f32 %v1220_v25, %v642_v52  ;;  %v684_v25 = vsel %vm347_vm0, %v670_v40, 0 }
 0x1cd   : > { %v677_v57 = vpack.c.bf16 %v669_v54, %v668_v53  ;;  %v667_v58 = vmax.f32 %v643_v55, 0.0 }
 0x1cf   : > { %v705_v59 = vsel %vm347_vm0, %v677_v57, 0  ;;  %v676_v62 = vpack.c.bf16 %v667_v58, %v666_v60 }
 0x1d0   : > { %932 = vmatpush3.bf16.xpose.msra.mxu0 %v705_v59 }
 0x1d1   : > { %933 = vmatprep.subr.bf16.mxu0 %v1062_v23  ;;  %v702_v1 = vsel %vm347_vm0, %v676_v62, 0 }
 0x1d8   : > { %934 = vmatpush3.bf16.xpose.msra.mxu0 %v702_v1 }
 0x1d9   : > { %935 = vmatprep.subr.bf16.mxu0 %v1062_v23 }
 0x1e0   : > { %936 = vmatpush3.bf16.xpose.msra.mxu0 %v699_v7 }
 0x1e1   : > { %937 = vmatprep.subr.bf16.mxu0 %v1062_v23 }
 0x1e8   : > { %938 = vmatpush3.bf16.xpose.msra.mxu0 %v696_v13 }
 0x1e9   : > { %939 = vmatprep.subr.bf16.mxu0 %v1062_v23 }
 0x1f0   : > { %940 = vmatpush3.bf16.xpose.msra.mxu0 %v693_v19 }
 0x1f1   : > { %941 = vmatprep.subr.bf16.mxu0 %v1062_v23 }
 0x1f8   : > { %942 = vmatpush3.bf16.xpose.msra.mxu0 %v690_v22 }
 0x1f9   : > { %943 = vmatprep.subr.bf16.mxu0 %v1062_v23 }
 0x200   : > { %944 = vmatpush3.bf16.xpose.msra.mxu0 %v687_v24 }
 0x201   : > { %945 = vmatprep.subr.bf16.mxu0 %v1062_v23 }
 0x208   : > { %946 = vmatpush3.bf16.xpose.msra.mxu0 %v684_v25 }
 0x20f   : > { %948 = vmatmul.mubr.msk.bf16.vlgmr.msra.gmra.mxu0 %vm347_vm0, %v678_v26 }
 0x2cf   : > { %v741_v28 = vpop.f32.mrf.mxu0 }
 0x2d0   : > { %v748_v29 = vadd.f32 %v747_v27, %v741_v28 }
 0x2d1   : > { %v949_v30 = vpop.f32.mrf.mxu0 }
 0x2d2   : > { %v749_v31 = vmul.f32 0.5, %v748_v29 }
 0x2d3   : > { %v744_v32 = vpop.f32.mrf.mxu0 }
 0x2d4   : > { %998 = vtanh.f32 %v749_v31 }
 0x2d5   : > { %v950_v23 = vpop.f32.mrf.mxu0 }
 0x2e1   : > { %v999_v33 = vpop.eup %998 }
 0x2e2   : > { %v751_v34 = vmul.f32 0.5, %v999_v33 }
 0x2e4   : > { %v752_v35 = vadd.f32 0.5, %v751_v34 }
 0x2e6   : > { %753 = vst [vmem:[%s284_s25] sm:$0x1] %v752_v35 }
 0x2e7   : > { %1013 = shalt.err (!%p1010_p3)
}
 0x2e8   : > { %s1014_s20 = scalar_lea.hbm %s765_s10, 16  ;;  %s1018_s22 = scalar_lea.hbm %s1298_s7, 32 }
 0x2e9   : > { %p1015_p4 = scmp.ne.s32.totalorder %s765_s10, %s1014_s20  ;;  %p1019_p9 = scmp.lt.s32.totalorder %s765_s10, %s1298_s7 }
 0x2ea   : > { %p1020_p10 = scmp.lt.s32.totalorder %s1018_s22, %s1014_s20 }
 0x2eb   : > { %p1016_p7 = pnand %p1015_p4, %p1143_p5 }
 0x2ec   : > { %p1021_p11 = por %p1020_p10, %p1019_p9 }
 0x2ed   : > { %p1017_p8 = pneg %p1016_p7 }
 0x2ef   : > { %p1022_p12 = pnand %p1021_p11, %p1017_p8 }
 0x2f1   : > { %1025 = shalt.err (!%p1022_p12)
}
 0x2f2   : > { %951 = dma.vmem_to_hbm [thread:$0]  (%p1143_p5), %s768_s6, 16, %s765_s10, %s755_s14  }
 0x2f3 PF: > { %p957_p13 = scmp.ge.s32.totalorder %s1060_s29, 2  ;;  %s779_s25 = sand.u32 1, %s1048_s26  }
 0x2f4   : > { %s780_s30 = scalar_lea.sflag [#allocation4], %s779_s25 }
 0x2f5   : > { %p954_p0 = pnand %p957_p13, %p1147_p6 }
 0x2f7   : > { %p955_p1 = pneg %p954_p0 }
 0x2f9   : > { %1043 = dma.done.wait (%p955_p1), %s780_s30, 16  }
 0x2fa   : > { %1045 = vsyncadd (%p955_p1), %s780_s30, 4294967280  ;;  %p18_p2 = scmp.ge.s32.totalorder %s1131_s8, 4   ;;  %s1301_s26 = smov %s1052_s27 }
 0x2fb   : > { %s1302_s27 = smov %s1056_s28  ;;  %s1303_s28 = smov %s1141_s11 }
 0x2fc   : > { %s1304_s29 = smov %s1131_s8  ;;  %20 = sbr.rel (!%p18_p2) target bundleno = 5 (0x5), region = 83 }
 0x301   :  { %784 = vsyncpa [#allocation4], 1 }
 0x302   :  { %786 = vsyncpa [#allocation4 + $0x1], 1 }

</bundles_post_ra>
